<compile_context>
chip_gen: v6e
topology: v6e:2x2x1
jax: 0.10.0
libtpu: 0.0.40
codegen_flags: <defaults>
</compile_context>

<pallas_src>
import functools

import jax
import jax.numpy as jnp
from jax.experimental import pallas as pl
from jax.experimental.pallas import tpu as pltpu

EPS = 1e-5  # PyTorch nn.LayerNorm default


# ---------------------------------------------------------------------------
# Tiling / VMEM heuristics
# ---------------------------------------------------------------------------
def _vmem_limit_bytes():
    """Per-generation scoped VMEM limit: ~3/4 of physical VMEM.

    v7x (64 MiB physical)  -> ~48 MiB;  v5e/v6e (128 MiB) -> ~96 MiB.
    Falls back to a value that is safe on every generation if the query fails.
    """
    phys = None
    try:
        phys = getattr(pltpu.get_tpu_info(), "vmem_capacity_bytes", None)
    except Exception:
        phys = None
    if not phys:
        phys = 64 * 1024 * 1024  # conservative: v7x physical VMEM per TensorCore
    return min(int(phys) * 3 // 4, 100 * 1024 * 1024)


def _pick_batch_tile(B, L, C, itemsize, vmem_limit):
    """Largest divisor of B whose (bt, L, C) block fits the VMEM budget while keeping
    >= 2 grid steps per TensorCore (v7x has 2 TCs) whenever B allows it."""
    # Per batch row in one grid step: double-buffered in + out blocks in the HBM dtype
    # plus ~3 full-size f32 temporaries live inside the kernel body.
    row_bytes = L * C * (4 * itemsize + 3 * 4)
    budget = vmem_limit * 2 // 3
    cap = max(1, budget // max(row_bytes, 1))
    if B >= 4:
        cap = min(cap, B // 4)   # >= 4 grid steps -> 2 per core on dual-TC v7x
    elif B >= 2:
        cap = min(cap, B // 2)   # at least 2 steps total for pipelining
    bt = 1
    for d in range(1, B + 1):
        if B % d == 0 and d <= cap:
            bt = d
    return bt


# ---------------------------------------------------------------------------
# Plain path (C is already lane-dense, i.e. >= 128 or not foldable)
# ---------------------------------------------------------------------------
def _plain_kernel(x_ref, w_ref, o_ref):
    # x_ref: (bt, L, C) block; w_ref: (1, C); o_ref: (bt, L, C).
    x = x_ref[...].astype(jnp.float32)

    # LayerNorm stats over the channel (lane) axis.  E[x^2] - mean^2 saves one
    # full-tile VPU op vs centering first; max(.,0) guards fp cancellation.
    mean = jnp.mean(x, axis=-1, keepdims=True)
    ex2 = jnp.mean(x * x, axis=-1, keepdims=True)
    var = jnp.maximum(ex2 - mean * mean, 0.0)
    x_norm = (x - mean) * jax.lax.rsqrt(var + EPS)

    # Subtract the per-batch-row mean over the sequence axis (dim=1).
    x_norm = x_norm - jnp.mean(x_norm, axis=1, keepdims=True)

    # LayerNorm bias cancels under the seq-mean subtraction; apply weight once,
    # fused with the output-dtype cast.
    o_ref[...] = (x_norm * w_ref[...]).astype(o_ref.dtype)


def _call_plain(x, weight, vmem_limit):
    B, L, C = x.shape
    bt = _pick_batch_tile(B, L, C, x.dtype.itemsize, vmem_limit)
    w2 = weight.astype(jnp.float32).reshape(1, C)
    # TODO(synk): B == 1 (or a single (1, L, C) row too large for VMEM) degenerates to
    # grid=1 with no pipelining; an L-tiled two-pass variant (resident VMEM scratch for
    # the seq-sum, pl.when init/finalize) would restore overlap for that corner.
    return pl.pallas_call(
        _plain_kernel,
        out_shape=jax.ShapeDtypeStruct((B, L, C), x.dtype),
        grid=(B // bt,),
        in_specs=[
            # If traces show exposed input DMA at steady state, pl.Buffered(3) on this
            # spec is the next knob (costs one extra input buffer of VMEM).
            pl.BlockSpec((bt, L, C), lambda i: (i, 0, 0)),
            pl.BlockSpec((1, C), lambda i: (0, 0)),
        ],
        out_specs=pl.BlockSpec((bt, L, C), lambda i: (i, 0, 0)),
        compiler_params=pltpu.CompilerParams(
            dimension_semantics=("parallel",),
            vmem_limit_bytes=vmem_limit,
        ),
    )(x, w2)


# ---------------------------------------------------------------------------
# Folded path (C < 128, 128 % C == 0): lane-dense I/O for small channel counts
# ---------------------------------------------------------------------------
def _exact_dot(v, a):
    """Segment-reduction matmul that stays ~f32 accurate even if the MXU path demotes
    f32 operands: split v into an exactly-representable bf16 "hi" part plus a small
    residual and sum the two products (the 1/C entries of `a` are exact in bf16)."""
    v_hi = v.astype(jnp.bfloat16).astype(jnp.float32)
    v_lo = v - v_hi
    return (jnp.dot(v_hi, a, preferred_element_type=jnp.float32)
            + jnp.dot(v_lo, a, preferred_element_type=jnp.float32))


def _folded_kernel(x_ref, w_ref, a_ref, o_ref, *, groups, channels):
    # x_ref: (1, L//g, g*C) block with g*C == 128 (lane-dense).  Lane j = s*C + c holds
    # original element (seq = lf*g + s, channel = c).
    x = x_ref[0].astype(jnp.float32)          # (Lf, 128)
    a = a_ref[...]                            # (128, 128) block-diag averaging matrix

    # Per-original-sequence-position LayerNorm stats = per-segment lane reductions,
    # done on the MXU (idle on this mem-bound kernel).
    mean = _exact_dot(x, a)                   # segment mean, replicated across segment
    ex2 = _exact_dot(x * x, a)                # segment E[x^2]
    var = jnp.maximum(ex2 - mean * mean, 0.0)
    xn = (x - mean) * jax.lax.rsqrt(var + EPS)

    # Mean over the original sequence = mean over the folded-L (sublane) axis, then an
    # exact per-channel average across the g lane segments via cyclic rolls by k*C
    # (period g*C = 128, so the result lands replicated in every segment).
    s = jnp.mean(xn, axis=0, keepdims=True)   # (1, 128)
    tot = s
    for k in range(1, groups):
        tot = tot + pltpu.roll(s, shift=k * channels, axis=1)
    seq_mean = tot * (1.0 / groups)

    o_ref[0] = ((xn - seq_mean) * w_ref[...]).astype(o_ref.dtype)


def _call_folded(x, weight, g, vmem_limit):
    B, L, C = x.shape
    lf, cf = L // g, g * C                    # cf == 128
    x_f = x.reshape(B, lf, cf)                # contiguous: free metadata reshape
    w_f = jnp.tile(weight.astype(jnp.float32), g).reshape(1, cf)
    seg = jnp.arange(cf) // C
    a_mat = (seg[:, None] == seg[None, :]).astype(jnp.float32) * (1.0 / C)

    kern = functools.partial(_folded_kernel, groups=g, channels=C)
    # TODO(synk): batch tile is fixed at 1 here (keeps the segment reductions as plain
    # 2-D MXU matmuls); for tiny L*C with huge B, packing several batch rows per block
    # would amortize the per-step pipeline overhead further.
    out_f = pl.pallas_call(
        kern,
        out_shape=jax.ShapeDtypeStruct((B, lf, cf), x.dtype),
        grid=(B,),
        in_specs=[
            pl.BlockSpec((1, lf, cf), lambda i: (i, 0, 0)),
            pl.BlockSpec((1, cf), lambda i: (0, 0)),
            pl.BlockSpec((cf, cf), lambda i: (0, 0)),
        ],
        out_specs=pl.BlockSpec((1, lf, cf), lambda i: (i, 0, 0)),
        compiler_params=pltpu.CompilerParams(
            dimension_semantics=("parallel",),
            vmem_limit_bytes=vmem_limit,
        ),
    )(x_f, w_f, a_mat)
    return out_f.reshape(B, L, C)


# ---------------------------------------------------------------------------
# Public wrapper
# ---------------------------------------------------------------------------
def my_layernorm(x, weight, bias=None):
    """x: [B, L, C]; weight, bias: [C]. Returns [B, L, C] in x.dtype.

    `bias` is accepted for API parity with nn.LayerNorm but cancels exactly in
    x_hat - mean_L(x_hat), so it never reaches the kernel.  HBM I/O stays in x.dtype
    (e.g. bf16); compute is f32 inside the kernel.
    """
    del bias
    B, L, C = x.shape
    vmem_limit = _vmem_limit_bytes()
    g = 128 // C if (C < 128 and 128 % C == 0) else 1
    if g > 1 and L % g == 0:
        return _call_folded(x, weight, g, vmem_limit)
    # TODO(synk): C < 128 but not foldable (128 % C != 0 or L % g != 0) still pays the
    # masked partial-store penalty; padding/segmenting that case is left as future work.
    return _call_plain(x, weight, vmem_limit)


# ---------------------------------------------------------------------------
# Reference + self-test
# ---------------------------------------------------------------------------
def _reference(x, weight, bias):
    xf = x.astype(jnp.float32)
    mean = jnp.mean(xf, axis=-1, keepdims=True)
    var = jnp.mean((xf - mean) ** 2, axis=-1, keepdims=True)
    x_hat = (xf - mean) / jnp.sqrt(var + EPS) * weight + bias
    return (x_hat - jnp.mean(x_hat, axis=1, keepdims=True)).astype(x.dtype)


if __name__ == "__main__":
    key = jax.random.PRNGKey(0)
    k1, k2, k3, k4 = jax.random.split(key, 4)

    def check(x, w, b, tol):
        out = jax.block_until_ready(my_layernorm(x, w, b))
        ref = _reference(x, w, b)
        assert out.shape == x.shape and out.dtype == x.dtype
        assert jnp.allclose(out.astype(jnp.float32), ref.astype(jnp.float32),
                            atol=tol, rtol=tol), "mismatch vs reference"

    # case 1: small C -> folded lane-dense path (C=32, g=4, grid=B)
    B, L, C = 2, 8, 32
    x = jax.random.normal(k1, (B, L, C), dtype=jnp.float32)
    w = 1.0 + 0.01 * jnp.arange(C, dtype=jnp.float32)
    b = 0.01 * jnp.arange(C, dtype=jnp.float32)
    check(x, w, b, 1e-4)

    # case 2: lane-dense C=128, batch-tiled plain path (bt=2, grid=4)
    B, L, C = 8, 16, 128
    x = jax.random.normal(k2, (B, L, C), dtype=jnp.float32)
    w = 1.0 + 0.005 * jnp.arange(C, dtype=jnp.float32)
    b = 0.005 * jnp.arange(C, dtype=jnp.float32)
    check(x, w, b, 1e-4)

    # case 3: bf16 HBM I/O (f32 compute inside), plain path, grid=4
    B, L, C = 4, 32, 256
    x = jax.random.normal(k3, (B, L, C), dtype=jnp.float32).astype(jnp.bfloat16)
    w = 1.0 + 0.002 * jnp.arange(C, dtype=jnp.float32)
    b = 0.002 * jnp.arange(C, dtype=jnp.float32)
    check(x, w, b, 5e-2)

    # case 4: small C that cannot fold (L % (128//C) != 0) -> plain fallback
    B, L, C = 2, 6, 32
    x = jax.random.normal(k4, (B, L, C), dtype=jnp.float32)
    w = jnp.ones((C,), jnp.float32)
    b = jnp.zeros((C,), jnp.float32)
    check(x, w, b, 1e-4)

    print("KERNEL_OK")
</pallas_src>

<mosaic_0001>
module attributes {stable_mosaic.version = 11 : i64} {
  func.func @_folded_kernel(%arg0: i32, %arg1: memref<1x2x128xf32, #tpu.memory_space<vmem>>, %arg2: memref<1x128xf32, #tpu.memory_space<vmem>>, %arg3: memref<128x128xf32, #tpu.memory_space<vmem>>, %arg4: memref<1x2x128xf32, #tpu.memory_space<vmem>>) attributes {dimension_semantics = [#tpu.dimension_semantics<parallel>], iteration_bounds = array<i64: 2>, scalar_prefetch = 0 : i64, scratch_operands = 0 : i64, tpu.core_type = #tpu.core_type<tc>, window_params = [{transform_indices = @transform_0, window_bounds = array<i64: 1, 2, 128>}, {pipeline_mode = #tpu.pipeline_mode<synchronous>, transform_indices = @transform_1, window_bounds = array<i64: 1, 128>}, {pipeline_mode = #tpu.pipeline_mode<synchronous>, transform_indices = @transform_2, window_bounds = array<i64: 128, 128>}, {transform_indices = @transform_3, window_bounds = array<i64: 1, 2, 128>}]} {
    %c0 = arith.constant 0 : index
    %c0_0 = arith.constant 0 : index
    %c0_1 = arith.constant 0 : index
    %0 = vector.load %arg1[%c0, %c0_0, %c0_1] : memref<1x2x128xf32, #tpu.memory_space<vmem>>, vector<1x2x128xf32>
    %1 = vector.shape_cast %0 : vector<1x2x128xf32> to vector<2x128xf32>
    %c0_2 = arith.constant 0 : index
    %c0_3 = arith.constant 0 : index
    %2 = vector.load %arg3[%c0_2, %c0_3] : memref<128x128xf32, #tpu.memory_space<vmem>>, vector<128x128xf32>
    %3 = arith.truncf %1 : vector<2x128xf32> to vector<2x128xbf16>
    %4 = arith.extf %3 : vector<2x128xbf16> to vector<2x128xf32>
    %5 = arith.subf %1, %4 : vector<2x128xf32>
    %cst = arith.constant dense<0.000000e+00> : vector<2x128xf32>
    %6 = tpu.matmul %4, %2, %cst {dimension_numbers = #tpu.dot_dimension_numbers<[1], [0], [0], [1], [0, 0, 1, 1], [], []>} : vector<2x128xf32>, vector<128x128xf32>, vector<2x128xf32> -> vector<2x128xf32>
    %cst_4 = arith.constant dense<0.000000e+00> : vector<2x128xf32>
    %7 = tpu.matmul %5, %2, %cst_4 {dimension_numbers = #tpu.dot_dimension_numbers<[1], [0], [0], [1], [0, 0, 1, 1], [], []>} : vector<2x128xf32>, vector<128x128xf32>, vector<2x128xf32> -> vector<2x128xf32>
    %8 = arith.addf %6, %7 : vector<2x128xf32>
    %9 = arith.mulf %1, %1 : vector<2x128xf32>
    %10 = arith.truncf %9 : vector<2x128xf32> to vector<2x128xbf16>
    %11 = arith.extf %10 : vector<2x128xbf16> to vector<2x128xf32>
    %12 = arith.subf %9, %11 : vector<2x128xf32>
    %cst_5 = arith.constant dense<0.000000e+00> : vector<2x128xf32>
    %13 = tpu.matmul %11, %2, %cst_5 {dimension_numbers = #tpu.dot_dimension_numbers<[1], [0], [0], [1], [0, 0, 1, 1], [], []>} : vector<2x128xf32>, vector<128x128xf32>, vector<2x128xf32> -> vector<2x128xf32>
    %cst_6 = arith.constant dense<0.000000e+00> : vector<2x128xf32>
    %14 = tpu.matmul %12, %2, %cst_6 {dimension_numbers = #tpu.dot_dimension_numbers<[1], [0], [0], [1], [0, 0, 1, 1], [], []>} : vector<2x128xf32>, vector<128x128xf32>, vector<2x128xf32> -> vector<2x128xf32>
    %15 = arith.addf %13, %14 : vector<2x128xf32>
    %16 = arith.mulf %8, %8 : vector<2x128xf32>
    %17 = arith.subf %15, %16 : vector<2x128xf32>
    %cst_7 = arith.constant 0.000000e+00 : f32
    %18 = vector.broadcast %cst_7 : f32 to vector<2x128xf32>
    %19 = arith.maximumf %17, %18 : vector<2x128xf32>
    %20 = arith.subf %1, %8 : vector<2x128xf32>
    %cst_8 = arith.constant 9.99999974E-6 : f32
    %21 = vector.broadcast %cst_8 : f32 to vector<2x128xf32>
    %22 = arith.addf %19, %21 : vector<2x128xf32>
    %23 = math.rsqrt %22 : vector<2x128xf32>
    %24 = arith.mulf %20, %23 : vector<2x128xf32>
    %cst_9 = arith.constant dense<0.000000e+00> : vector<128xf32>
    %25 = vector.multi_reduction <add>, %24, %cst_9 [0] : vector<2x128xf32> to vector<128xf32>
    %26 = vector.shape_cast %25 : vector<128xf32> to vector<1x128xf32>
    %cst_10 = arith.constant 2.000000e+00 : f32
    %27 = vector.broadcast %cst_10 : f32 to vector<1x128xf32>
    %28 = arith.divf %26, %27 : vector<1x128xf32>
    %c32_i32 = arith.constant 32 : i32
    %29 = tpu.dynamic_rotate %28 by %c32_i32 dim 1 : vector<1x128xf32>, i32 -> vector<1x128xf32>
    %30 = arith.addf %28, %29 : vector<1x128xf32>
    %c64_i32 = arith.constant 64 : i32
    %31 = tpu.dynamic_rotate %28 by %c64_i32 dim 1 : vector<1x128xf32>, i32 -> vector<1x128xf32>
    %32 = arith.addf %30, %31 : vector<1x128xf32>
    %c96_i32 = arith.constant 96 : i32
    %33 = tpu.dynamic_rotate %28 by %c96_i32 dim 1 : vector<1x128xf32>, i32 -> vector<1x128xf32>
    %34 = arith.addf %32, %33 : vector<1x128xf32>
    %cst_11 = arith.constant 2.500000e-01 : f32
    %35 = vector.broadcast %cst_11 : f32 to vector<1x128xf32>
    %36 = arith.mulf %34, %35 : vector<1x128xf32>
    %37 = vector.broadcast %36 : vector<1x128xf32> to vector<2x128xf32>
    %38 = arith.subf %24, %37 : vector<2x128xf32>
    %c0_12 = arith.constant 0 : index
    %c0_13 = arith.constant 0 : index
    %39 = vector.load %arg2[%c0_12, %c0_13] : memref<1x128xf32, #tpu.memory_space<vmem>>, vector<1x128xf32>
    %40 = vector.broadcast %39 : vector<1x128xf32> to vector<2x128xf32>
    %41 = arith.mulf %38, %40 : vector<2x128xf32>
    %c0_14 = arith.constant 0 : index
    %c0_15 = arith.constant 0 : index
    %c0_16 = arith.constant 0 : index
    %42 = vector.load %arg4[%c0_14, %c0_15, %c0_16] : memref<1x2x128xf32, #tpu.memory_space<vmem>>, vector<1x2x128xf32>
    %43 = vector.shape_cast %42 : vector<1x2x128xf32> to vector<2x128xf32>
    %44 = vector.shape_cast %41 : vector<2x128xf32> to vector<1x2x128xf32>
    tpu.vector_store %arg4[%c0_14, %c0_15, %c0_16], %44 {strides = array<i32>} : memref<1x2x128xf32, #tpu.memory_space<vmem>>, vector<1x2x128xf32>,
    return
  }
  func.func @transform_0(%arg0: i32) -> (i32, i32, i32) {
    %c0_i32 = arith.constant 0 : i32
    %c0_i32_0 = arith.constant 0 : i32
    %c0_i32_1 = arith.constant 0 : i32
    return %arg0, %c0_i32, %c0_i32_0 : i32, i32, i32
  }
  func.func @transform_1(%arg0: i32) -> (i32, i32) {
    %c0_i32 = arith.constant 0 : i32
    %c0_i32_0 = arith.constant 0 : i32
    %c0_i32_1 = arith.constant 0 : i32
    return %c0_i32, %c0_i32_0 : i32, i32
  }
  func.func @transform_2(%arg0: i32) -> (i32, i32) {
    %c0_i32 = arith.constant 0 : i32
    %c0_i32_0 = arith.constant 0 : i32
    %c0_i32_1 = arith.constant 0 : i32
    return %c0_i32, %c0_i32_0 : i32, i32
  }
  func.func @transform_3(%arg0: i32) -> (i32, i32, i32) {
    %c0_i32 = arith.constant 0 : i32
    %c0_i32_0 = arith.constant 0 : i32
    %c0_i32_1 = arith.constant 0 : i32
    return %arg0, %c0_i32, %c0_i32_0 : i32, i32, i32
  }
}

</mosaic_0001>

<bundles_post_ra>
// kernel: tpu_custom_call.1
= control target key start
LH: loop header
LB: loop body
LE: loop exit
PB: predicated region body
PF: predicated region fallthrough
CT: control target
= control target key end

     0   :  { %8 = vsyncpa [#allocation3], 0  ;;  %s1423_s0 = inlined_call_operand.hbm [shape: f32[2,2,128], index: 0, kind: input, shape index: {}]   ;;  %s1424_s1 = inlined_call_operand.vmem [shape: f32[1,128], index: 1, kind: input, shape index: {}]   ;;  %s1425_s2 = inlined_call_operand.hbm [shape: f32[128,128], index: 2, kind: input, shape index: {}]   ;;  %s1426_s3 = inlined_call_operand.hbm [shape: f32[2,2,128], index: 3, kind: output, shape index: {}]  }
   0x1   :  { %10 = vsyncpa [#allocation3 + $0x1], 0 }
   0x2   :  { %11 = vsyncpa [#allocation6], 0 }
   0x3   :  { %12 = vsyncpa [#allocation4], 0 }
   0x4   :  { %14 = vsyncpa [#allocation4 + $0x1], 0  ;;  %s1083_s12 = smov 0   ;;  %s1085_s13 = smov 0  }
   0x5   :  { %s1087_s14 = smov 0   ;;  %s1089_s15 = smov 0  }
   0x6 LB: > { %s1104_s16 = sadd.s32 4294967295, %s1051_s15   ;;  %s640_s17 = sadd.s32 4294967294, %s1051_s15   ;;  %s1051_s15 = sphi %s1089_s15, %s1448_s15   ;;  %s1047_s14 = sphi %s1087_s14, %s1447_s14   ;;  %s1043_s13 = sphi %s1085_s13, %s1446_s13   ;;  %s1039_s12 = sphi %s1083_s12, %s1445_s12  }
   0x7   : > { %p40_p0 = scmp.ne.s32.totalorder %s1043_s13, %s1039_s12  ;;  %p1427_p1 = scmp.eq.s32.totalorder %s1104_s16, 0 }
   0x8   : > { %p112_p3 = scmp.eq.s32.totalorder %s640_s17, 1  ;;  %p641_p5 = scmp.ge.s32.totalorder %s1051_s15, 1 }
   0x9   : > { %p1113_p4 = por %p1427_p1, %p40_p0  ;;  %p119_p7 = scmp.lt.s32.totalorder %s1051_s15, 3 }
   0xa   : > { %p1118_p6 = por %p112_p3, %p40_p0  ;;  %s1053_s21 = smov [#allocation5]  }
   0xb   : > { %s1431_s18 = scalar_select %p1113_p4, 1, 0 }
   0xc   : > { %s1432_s19 = scalar_select %p1118_p6, 1, 0 }
   0xd   : > { %p1123_p8 = pnand %p641_p5, %p119_p7  ;;  %s134_s22 = sshll.u32 %s1053_s21, 4  ;;  %s135_s22 = int_to_ptr.vmem [resolvable:$true] %s134_s22 }
   0xe   : > { %s1137_s24 = sadd.s32 1, %s1051_s15   ;;  %s27_s25 = sadd.s32 1, %s1047_s14 }
   0xf   : > { %s1433_s20 = scalar_select %p1123_p8, 1, 0 }
  0x10   : > { %p871_p9 = pneg %p1123_p8  ;;  %s24_s26 = ssub.s32 %s1051_s15, %s1137_s24 }
  0x11   : > { %s940_s27 = scalar_lea.vmem %s135_s22, 2048  ;;  %p948_p5 = scmp.lt.s32.totalorder %s135_s22, %s135_s22 }
  0x12   : > { %p1132_p11 = pnand %p871_p9, %p1427_p1  ;;  %p941_p13 = scmp.ne.s32.totalorder %s135_s22, %s940_s27 }
  0x13   : > { %p949_p7 = scmp.lt.s32.totalorder %s940_s27, %s940_s27 }
  0x14   : > { %p931_p12 = pneg %p1132_p11 }
  0x15   : > { %p950_p10 = por %p949_p7, %p948_p5 }
  0x16   : > { %p943_p0 = pnand %p941_p13, %p931_p12 }
  0x18   : > { %p944_p3 = pneg %p943_p0 }
  0x1a   : > { %p951_p2 = pnand %p950_p10, %p944_p3 }
  0x1c   : > { %954 = shalt.err (!%p951_p2)
}
  0x1d   : > { %s1054_s28 = smov 128   ;;  %s1055_s29 = smov 8  }
  0x1e   : > { %874 = dma.hbm_to_vmem [thread:$0]  (!%p1132_p11), %s1425_s2, 2048, %s135_s22, [#allocation6], %s1054_s28, %s1054_s28, %s1055_s29  }
  0x1f   : > { %p25_p9 = scmp.eq.s32.totalorder %s24_s26, 0  ;;  %p34_p12 = scmp.ne.s32.totalorder %s1047_s14, %s1043_s13 }
  0x20   : > { %p35_p10 = scmp.eq.s32.totalorder %s1051_s15, 0  ;;  %p884_p2 = scmp.lt.s32.totalorder %s1051_s15, 2 }
  0x21   : > { %s1154_s5 = scalar_select %p25_p9, %s1047_s14, %s27_s25  }
  0x22   : > { %p36_p13 = por %p35_p10, %p34_p12  ;;  %p1435_p0 = scmp.eq.s32.totalorder %s1104_s16, 1 }
  0x23   : > { %s148_s7 = sand.u32 1, %s1047_s14   ;;  %s645_s8 = sshll.u32 %s1051_s15, 5 }
  0x24   : > { %p1158_p3 = por %p1435_p0, %p34_p12  ;;  %s644_s9 = sshll.u32 %s148_s7, 1 }
  0x25   : > { %s1167_s17 = scalar_lea.hbm %s1423_s0, %s645_s8  ;;  %s152_s21 = scalar_lea.vmem [#allocation2], %s644_s9 }
  0x26   : > { %s1436_s6 = scalar_select %p1158_p3, 1, 0 }
  0x27   : > { %s159_s22 = sshll.u32 %s152_s21, 4  ;;  %p1169_p11 = pnand %p884_p2, %p36_p13  ;;  %s160_s22 = int_to_ptr.vmem [resolvable:$true] %s159_s22 }
  0x28   : > { %s149_s25 = scalar_lea.sflag [#allocation3], %s148_s7  ;;  %s955_s26 = scalar_lea.hbm %s1167_s17, 32 }
  0x29   : > { %p956_p5 = scmp.ne.s32.totalorder %s1167_s17, %s955_s26  ;;  %p957_p7 = pneg %p1169_p11 }
  0x2a   : > { %s960_s29 = scalar_lea.hbm %s1423_s0, 64  ;;  %p961_p10 = scmp.lt.s32.totalorder %s1167_s17, %s1423_s0 }
  0x2b   : > { %p958_p9 = pnand %p957_p7, %p956_p5  ;;  %p962_p2 = scmp.lt.s32.totalorder %s960_s29, %s955_s26 }
  0x2d   : > { %p959_p12 = pneg %p958_p9  ;;  %p963_p13 = por %p962_p2, %p961_p10 }
  0x2f   : > { %p964_p0 = pnand %p963_p13, %p959_p12 }
  0x31   : > { %967 = shalt.err (!%p964_p0)
}
  0x32   : > { %s968_s8 = scalar_lea.vmem %s160_s22, 32  ;;  %s1056_s7 = smov [#allocation2]  }
  0x33   : > { %p969_p1 = scmp.ne.s32.totalorder %s160_s22, %s968_s8  ;;  %s973_s9 = sshll.u32 %s1056_s7, 4  ;;  %s974_s9 = int_to_ptr.vmem [resolvable:$false] %s973_s9 }
  0x34   : > { %s975_s10 = scalar_lea.vmem %s974_s9, 64  ;;  %p976_p5 = scmp.lt.s32.totalorder %s160_s22, %s974_s9 }
  0x35   : > { %p971_p6 = pnand %p969_p1, %p957_p7  ;;  %p977_p9 = scmp.lt.s32.totalorder %s975_s10, %s968_s8 }
  0x37   : > { %p972_p3 = pneg %p971_p6  ;;  %p978_p4 = por %p977_p9, %p976_p5 }
  0x39   : > { %p979_p8 = pnand %p978_p4, %p972_p3 }
  0x3b   : > { %982 = shalt.err (!%p979_p8)
}
  0x3c   : > { %878 = dma.hbm_to_vmem [thread:$0]  (!%p1169_p11), %s1167_s17, 32, %s160_s22, %s149_s25  }
  0x3d   : > { %p1438_p12 = scmp.ne.s32.totalorder %s1433_s20, 0 }
  0x3e   : > { %s1190_s11 = sand.u32 (!%p1438_p12), 1, %s1043_s13   ;;  %p1439_p1 = scmp.ne.s32.totalorder (!%p1438_p12), %s1431_s18, 0 }
  0x3f   : > { %168 = sbr.rel (%p1438_p12) target bundleno = 516 (0x204), region = 32  ;;  %s647_s21 = sshll.u32 (!%p1438_p12), %s1190_s11, 1 }
  0x40   : > { %s171_s26 = scalar_lea.sflag (!%p1438_p12), [#allocation3], %s1190_s11  ;;  %s1196_s27 = scalar_lea.vmem (!%p1438_p12), [#allocation2], %s647_s21 }
  0x44   : > { %1026 = dma.done.wait (%p1439_p1), %s171_s26, 32  }
  0x45   : > { %1028 = vsyncadd (%p1439_p1), %s171_s26, 4294967264  ;;  %p1440_p4 = scmp.eq.s32.totalorder %s1104_s16, 0 }
  0x47   : > { %1030 = dma.done.wait (%p1440_p4), [#allocation6], 2048   ;;  %p1441_p6 = pmov %p1440_p4 }
  0x48   : > { %v1057_v0 = vmov 0.0   ;;  %vm1058_vm0 = vmmov 0   ;;  %v1212_v1 = vld [vmem:[#allocation5 + $0x78] sm:$0xff]  ;;  %v1214_v2 = vld [vmem:[#allocation5 + $0x70] sm:$0xff]  ;;  %v1220_v3 = vld [vmem:[#allocation5 + $0x68] sm:$0xff]  ;;  %vm512_vm1 = vcmask 1041408   ;;  %v532_v50 = vlaneseq }
  0x49   : > { %1032 = vsyncadd (%p1441_p6), [#allocation6], 4294965248  ;;  %723 = vmatprep.subr.mxu0 %v1057_v0  ;;  %758 = vmatprep.subr.mxu1 %v1057_v0  ;;  %v1226_v4 = vld [vmem:[#allocation5 + $0x60] sm:$0xff]  ;;  %v1232_v5 = vld [vmem:[#allocation5 + $0x58] sm:$0xff]  ;;  %s1059_s18 = smov 96   ;;  %s1060_s20 = smov 32  }
  0x4a   : > { %755 = vmatprep.mubr.msk.f32.mxu0 %vm1058_vm0, %v1057_v0  ;;  %790 = vmatprep.mubr.msk.f32.mxu1 %vm1058_vm0, %v1057_v0  ;;  %v1238_v6 = vld [vmem:[#allocation5 + $0x50] sm:$0xff]  ;;  %v1244_v7 = vld [vmem:[#allocation5 + $0x48] sm:$0xff]  ;;  %v1250_v8 = vld [vmem:[#allocation5 + $0x40] sm:$0xff]  ;;  %s1061_s17 = smov 64   ;;  %v533_v53 = vshrl.u32 %v532_v50, 7  ;;  %s652_s25 = sshll.u32 %s1104_s16, 5 }
  0x4b   : > { %724 = vmatpush3.msra.mxu0 %v1212_v1  ;;  %759 = vmatpush3.msra.mxu1 %v1212_v1  ;;  %v1256_v9 = vld [vmem:[#allocation5 + $0x38] sm:$0xff]  ;;  %v1262_v10 = vld [vmem:[#allocation5 + $0x30] sm:$0xff]  ;;  %v1271_v12 = vld [vmem:[#allocation5 + $0x28] sm:$0xff]  ;;  %s200_s28 = scalar_lea.vmem [#allocation7], %s647_s21  ;;  %s558_s8 = scalar_lea.hbm %s1426_s3, %s652_s25 }
  0x4c   : > { %725 = vmatprep.subr.mxu0 %v1057_v0  ;;  %760 = vmatprep.subr.mxu1 %v1057_v0  ;;  %v1267_v11 = vld [vmem:[%s1196_s27] sm:$0x3]  ;;  %v1277_v13 = vld [vmem:[#allocation5 + $0x20] sm:$0xff]  ;;  %v1291_v16 = vld [vmem:[#allocation5 + $0x10] sm:$0xff]  ;;  %v534_v57 = vsub.s32 0, %v533_v53  ;;  %s560_s29 = sshll.u32 %s200_s28, 4  ;;  %s561_s29 = int_to_ptr.vmem [resolvable:$true] %s560_s29 }
  0x4d   : > { %726 = vmatpush3.msra.mxu0 %v1214_v2  ;;  %761 = vmatpush3.msra.mxu1 %v1214_v2  ;;  %v218_v14 = vpack.c.bf16 %v1267_v11, %v1267_v11  ;;  %v1285_v15 = vld [vmem:[#allocation5 + $0x18] sm:$0xff]  ;;  %v1297_v18 = vld [vmem:[#allocation5 + $0x8] sm:$0xff]  ;;  %v1303_v19 = vld [vmem:[#allocation5] sm:$0xff]  ;;  %v361_v21 = vmul.f32 %v1267_v11, %v1267_v11  ;;  %s547_s7 = scalar_lea.sflag [#allocation4], %s1190_s11  ;;  %s983_s9 = scalar_lea.vmem %s561_s29, 32 }
  0x4e   : > { %727 = vmatprep.subr.mxu0 %v1057_v0  ;;  %762 = vmatprep.subr.mxu1 %v1057_v0  ;;  %v650_v61 = vld [vmem:[%s1424_s1] ss:$0 sm:$0xff]  ;;  %p984_p8 = scmp.ne.s32.totalorder %s561_s29, %s983_s9  ;;  %p1442_p3 = scmp.ne.s32.totalorder %s1436_s6, 0 }
  0x4f   : > { %728 = vmatpush3.msra.mxu0 %v1220_v3  ;;  %763 = vmatpush3.msra.mxu1 %v1220_v3  ;;  %v219_v17 = vunpack.c.l.bf16 %v218_v14  ;;  %v362_v22 = vpack.c.bf16 %v361_v21, %v361_v21  ;;  %s1062_s10 = smov [#allocation7]  }
  0x50   : > { %729 = vmatprep.subr.mxu0 %v1057_v0  ;;  %764 = vmatprep.subr.mxu1 %v1057_v0  ;;  %p985_p11 = pnand %p984_p8, %p1442_p3  ;;  %s987_s26 = sshll.u32 %s1062_s10, 4  ;;  %s988_s26 = int_to_ptr.vmem [resolvable:$false] %s987_s26 }
  0x51   : > { %730 = vmatpush3.msra.mxu0 %v1226_v4  ;;  %765 = vmatpush3.msra.mxu1 %v1226_v4  ;;  %v220_v20 = vsub.f32 %v1267_v11, %v219_v17  ;;  %v363_v23 = vunpack.c.l.bf16 %v362_v22  ;;  %s989_s16 = scalar_lea.vmem %s988_s26, 64  ;;  %p990_p10 = scmp.lt.s32.totalorder %s561_s29, %s988_s26 }
  0x52   : > { %731 = vmatprep.subr.mxu0 %v1057_v0  ;;  %766 = vmatprep.subr.mxu1 %v1057_v0  ;;  %p986_p7 = pneg %p985_p11  ;;  %p991_p2 = scmp.lt.s32.totalorder %s989_s16, %s983_s9 }
  0x53   : > { %732 = vmatpush3.msra.mxu0 %v1232_v5  ;;  %767 = vmatpush3.msra.mxu1 %v1232_v5  ;;  %v364_v24 = vsub.f32 %v361_v21, %v363_v23 }
  0x54   : > { %733 = vmatprep.subr.mxu0 %v1057_v0  ;;  %768 = vmatprep.subr.mxu1 %v1057_v0  ;;  %p992_p13 = por %p991_p2, %p990_p10 }
  0x55   : > { %734 = vmatpush3.msra.mxu0 %v1238_v6  ;;  %769 = vmatpush3.msra.mxu1 %v1238_v6 }
  0x56   : > { %735 = vmatprep.subr.mxu0 %v1057_v0  ;;  %770 = vmatprep.subr.mxu1 %v1057_v0  ;;  %p993_p0 = pnand %p992_p13, %p986_p7 }
  0x57   : > { %736 = vmatpush3.msra.mxu0 %v1244_v7  ;;  %771 = vmatpush3.msra.mxu1 %v1244_v7 }
  0x58   : > { %737 = vmatprep.subr.mxu0 %v1057_v0  ;;  %772 = vmatprep.subr.mxu1 %v1057_v0 }
  0x59   : > { %738 = vmatpush3.msra.mxu0 %v1250_v8  ;;  %773 = vmatpush3.msra.mxu1 %v1250_v8 }
  0x5a   : > { %739 = vmatprep.subr.mxu0 %v1057_v0  ;;  %774 = vmatprep.subr.mxu1 %v1057_v0 }
  0x5b   : > { %740 = vmatpush3.msra.mxu0 %v1256_v9  ;;  %775 = vmatpush3.msra.mxu1 %v1256_v9 }
  0x5c   : > { %741 = vmatprep.subr.mxu0 %v1057_v0  ;;  %776 = vmatprep.subr.mxu1 %v1057_v0 }
  0x5d   : > { %742 = vmatpush3.msra.mxu0 %v1262_v10  ;;  %777 = vmatpush3.msra.mxu1 %v1262_v10 }
  0x5e   : > { %743 = vmatprep.subr.mxu0 %v1057_v0  ;;  %778 = vmatprep.subr.mxu1 %v1057_v0 }
  0x5f   : > { %744 = vmatpush3.msra.mxu0 %v1271_v12  ;;  %779 = vmatpush3.msra.mxu1 %v1271_v12 }
  0x60   : > { %745 = vmatprep.subr.mxu0 %v1057_v0  ;;  %780 = vmatprep.subr.mxu1 %v1057_v0 }
  0x61   : > { %746 = vmatpush3.msra.mxu0 %v1277_v13  ;;  %781 = vmatpush3.msra.mxu1 %v1277_v13 }
  0x62   : > { %747 = vmatprep.subr.mxu0 %v1057_v0  ;;  %782 = vmatprep.subr.mxu1 %v1057_v0 }
  0x63   : > { %748 = vmatpush3.msra.mxu0 %v1285_v15  ;;  %783 = vmatpush3.msra.mxu1 %v1285_v15 }
  0x64   : > { %749 = vmatprep.subr.mxu0 %v1057_v0  ;;  %784 = vmatprep.subr.mxu1 %v1057_v0 }
  0x65   : > { %750 = vmatpush3.msra.mxu0 %v1291_v16  ;;  %785 = vmatpush3.msra.mxu1 %v1291_v16 }
  0x66   : > { %751 = vmatprep.subr.mxu0 %v1057_v0  ;;  %786 = vmatprep.subr.mxu1 %v1057_v0 }
  0x67   : > { %752 = vmatpush3.msra.mxu0 %v1297_v18  ;;  %787 = vmatpush3.msra.mxu1 %v1297_v18 }
  0x68   : > { %753 = vmatprep.subr.mxu0 %v1057_v0  ;;  %788 = vmatprep.subr.mxu1 %v1057_v0 }
  0x69   : > { %754 = vmatpush3.msra.mxu0 %v1303_v19  ;;  %789 = vmatpush3.msra.mxu1 %v1303_v19 }
  0x6a   : > { %756 = vmatmul.mubr.f32.vlgmr.msra.gmra.mxu0 %v220_v20  ;;  %791 = vmatmul.mubr.f32.vlgmr.msra.gmra.mxu1 %v219_v17 }
  0x6b   : > { %793 = vmatprep.subr.mxu0 %v1057_v0  ;;  %828 = vmatprep.subr.mxu1 %v1057_v0 }
  0x6c   : > { %794 = vmatpush3.msra.mxu0 %v1212_v1  ;;  %829 = vmatpush3.msra.mxu1 %v1212_v1 }
  0x6d   : > { %795 = vmatprep.subr.mxu0 %v1057_v0  ;;  %830 = vmatprep.subr.mxu1 %v1057_v0 }
  0x6e   : > { %796 = vmatpush3.msra.mxu0 %v1214_v2  ;;  %831 = vmatpush3.msra.mxu1 %v1214_v2 }
  0x6f   : > { %797 = vmatprep.subr.mxu0 %v1057_v0  ;;  %832 = vmatprep.subr.mxu1 %v1057_v0 }
  0x70   : > { %798 = vmatpush3.msra.mxu0 %v1220_v3  ;;  %833 = vmatpush3.msra.mxu1 %v1220_v3 }
  0x71   : > { %799 = vmatprep.subr.mxu0 %v1057_v0  ;;  %834 = vmatprep.subr.mxu1 %v1057_v0 }
  0x72   : > { %800 = vmatpush3.msra.mxu0 %v1226_v4  ;;  %835 = vmatpush3.msra.mxu1 %v1226_v4 }
  0x73   : > { %801 = vmatprep.subr.mxu0 %v1057_v0  ;;  %836 = vmatprep.subr.mxu1 %v1057_v0 }
  0x74   : > { %802 = vmatpush3.msra.mxu0 %v1232_v5  ;;  %837 = vmatpush3.msra.mxu1 %v1232_v5 }
  0x75   : > { %803 = vmatprep.subr.mxu0 %v1057_v0  ;;  %838 = vmatprep.subr.mxu1 %v1057_v0 }
  0x76   : > { %804 = vmatpush3.msra.mxu0 %v1238_v6  ;;  %839 = vmatpush3.msra.mxu1 %v1238_v6 }
  0x77   : > { %805 = vmatprep.subr.mxu0 %v1057_v0  ;;  %840 = vmatprep.subr.mxu1 %v1057_v0 }
  0x78   : > { %806 = vmatpush3.msra.mxu0 %v1244_v7  ;;  %841 = vmatpush3.msra.mxu1 %v1244_v7 }
  0x79   : > { %807 = vmatprep.subr.mxu0 %v1057_v0  ;;  %842 = vmatprep.subr.mxu1 %v1057_v0 }
  0x7a   : > { %808 = vmatpush3.msra.mxu0 %v1250_v8  ;;  %843 = vmatpush3.msra.mxu1 %v1250_v8 }
  0x7b   : > { %809 = vmatprep.subr.mxu0 %v1057_v0  ;;  %844 = vmatprep.subr.mxu1 %v1057_v0 }
  0x7c   : > { %810 = vmatpush3.msra.mxu0 %v1256_v9  ;;  %845 = vmatpush3.msra.mxu1 %v1256_v9 }
  0x7d   : > { %811 = vmatprep.subr.mxu0 %v1057_v0  ;;  %846 = vmatprep.subr.mxu1 %v1057_v0 }
  0x7e   : > { %812 = vmatpush3.msra.mxu0 %v1262_v10  ;;  %847 = vmatpush3.msra.mxu1 %v1262_v10 }
  0x7f   : > { %813 = vmatprep.subr.mxu0 %v1057_v0  ;;  %848 = vmatprep.subr.mxu1 %v1057_v0 }
  0x80   : > { %814 = vmatpush3.msra.mxu0 %v1271_v12  ;;  %849 = vmatpush3.msra.mxu1 %v1271_v12 }
  0x81   : > { %815 = vmatprep.subr.mxu0 %v1057_v0  ;;  %850 = vmatprep.subr.mxu1 %v1057_v0 }
  0x82   : > { %816 = vmatpush3.msra.mxu0 %v1277_v13  ;;  %851 = vmatpush3.msra.mxu1 %v1277_v13 }
  0x83   : > { %817 = vmatprep.subr.mxu0 %v1057_v0  ;;  %852 = vmatprep.subr.mxu1 %v1057_v0 }
  0x84   : > { %818 = vmatpush3.msra.mxu0 %v1285_v15  ;;  %853 = vmatpush3.msra.mxu1 %v1285_v15 }
  0x85   : > { %819 = vmatprep.subr.mxu0 %v1057_v0  ;;  %854 = vmatprep.subr.mxu1 %v1057_v0 }
  0x86   : > { %820 = vmatpush3.msra.mxu0 %v1291_v16  ;;  %855 = vmatpush3.msra.mxu1 %v1291_v16 }
  0x87   : > { %821 = vmatprep.subr.mxu0 %v1057_v0  ;;  %856 = vmatprep.subr.mxu1 %v1057_v0 }
  0x88   : > { %822 = vmatpush3.msra.mxu0 %v1297_v18  ;;  %857 = vmatpush3.msra.mxu1 %v1297_v18 }
  0x89   : > { %823 = vmatprep.subr.mxu0 %v1057_v0  ;;  %858 = vmatprep.subr.mxu1 %v1057_v0 }
  0x8a   : > { %824 = vmatpush3.msra.mxu0 %v1303_v19  ;;  %825 = vmatprep.mubr.msk.f32.mxu0 %vm1058_vm0, %v1057_v0 }
  0x8b   : > { %859 = vmatpush3.msra.mxu1 %v1303_v19  ;;  %860 = vmatprep.mubr.msk.f32.mxu1 %vm1058_vm0, %v1057_v0 }
  0x8c   : > { %826 = vmatmul.mubr.f32.vlgmr.msra.gmra.mxu0 %v364_v24  ;;  %861 = vmatmul.mubr.f32.vlgmr.msra.gmra.mxu1 %v363_v23 }
 0x12a   : > { %v287_v25 = vpop.f32.mrf.mxu0  ;;  %v357_v26 = vpop.f32.mrf.mxu1 }
 0x12b   : > { %v358_v29 = vadd.f32 %v357_v26, %v287_v25 }
 0x12c   : > { %v757_v27 = vpop.f32.mrf.mxu0  ;;  %v792_v28 = vpop.f32.mrf.mxu1 }
 0x12d   : > { %v505_v32 = vmul.f32 %v358_v29, %v358_v29  ;;  %v508_v39 = vsub.f32 %v1267_v11, %v358_v29 }
 0x14c   : > { %v431_v30 = vpop.f32.mrf.mxu0  ;;  %v501_v31 = vpop.f32.mrf.mxu1 }
 0x14d   : > { %v502_v33 = vadd.f32 %v501_v31, %v431_v30 }
 0x14e   : > { %v827_v34 = vpop.f32.mrf.mxu0  ;;  %v862_v35 = vpop.f32.mrf.mxu1 }
 0x14f   : > { %v506_v36 = vsub.f32 %v502_v33, %v505_v32 }
 0x151   : > { %v507_v37 = vmax.f32 %v506_v36, 0.0 }
 0x153   : > { %v509_v38 = vadd.f32 1e-05, %v507_v37 }
 0x155   : > { %927 = vrsqrt.f32 %v509_v38 }
 0x162   : > { %v928_v40 = vpop.eup %927 }
 0x163   : > { %v511_v41 = vmul.f32 %v928_v40, %v508_v39 }
 0x165   : > { %v513_v42 = vsel %vm512_vm1, %v511_v41, 0.0 }
 0x166   : > { %v514_v43 = vrot.slane %v513_v42, 4 }
 0x168   : > { %v515_v44 = vadd.f32 %v514_v43, %v513_v42 }
 0x16a   : > { %v516_v45 = vrot.slane %v515_v44, 2 }
 0x16c   : > { %v517_v46 = vadd.f32 %v516_v45, %v515_v44 }
 0x16e   : > { %v518_v47 = vrot.slane %v517_v46, 1 }
 0x170   : > { %v519_v48 = vadd.f32 %v518_v47, %v517_v46 }
 0x172   : > { %v521_v49 = vmul.f32 0.5, %v519_v48 }
 0x174   : > { %528 = vrot.lane.b32.xlu1 %v521_v49, %s1059_s18  ;;  %522 = vrot.lane.b32.xlu0 %v521_v49, %s1060_s20 }
 0x178   : > { %525 = vrot.lane.b32.xlu0 %v521_v49, %s1061_s17 }
 0x1e6   : > { %v523_v51 = vpop.permute.xlu0 %522  ;;  %v529_v56 = vpop.permute.xlu1 %528 }
 0x1e7   : > { %v524_v52 = vadd.f32 %v523_v51, %v521_v49 }
 0x1ea   : > { %v526_v54 = vpop.permute.xlu0 %525 }
 0x1eb   : > { %v527_v55 = vadd.f32 %v526_v54, %v524_v52 }
 0x1ed   : > { %v530_v58 = vadd.f32 %v529_v56, %v527_v55 }
 0x1ef   : > { %v531_v59 = vmul.f32 0.25, %v530_v58 }
 0x1f1   : > { %v535_v60 = vrot.slane %v531_v59, %v534_v57 }
 0x1f3   : > { %v536_v62 = vsub.f32 %v511_v41, %v535_v60 }
 0x1f5   : > { %v544_v63 = vmul.f32 %v650_v61, %v536_v62 }
 0x1f7   : > { %545 = vst [vmem:[%s200_s28] sm:$0x3] %v544_v63 }
 0x1f8   : > { %996 = shalt.err (!%p993_p0)
}
 0x1f9   : > { %s997_s21 = scalar_lea.hbm %s558_s8, 32  ;;  %s1001_s18 = scalar_lea.hbm %s1426_s3, 64 }
 0x1fa   : > { %p998_p5 = scmp.ne.s32.totalorder %s558_s8, %s997_s21  ;;  %p1002_p1 = scmp.lt.s32.totalorder %s558_s8, %s1426_s3 }
 0x1fb   : > { %p1003_p4 = scmp.lt.s32.totalorder %s1001_s18, %s997_s21 }
 0x1fc   : > { %p999_p9 = pnand %p998_p5, %p1442_p3 }
 0x1fd   : > { %p1004_p6 = por %p1003_p4, %p1002_p1 }
 0x1fe   : > { %p1000_p12 = pneg %p999_p9 }
 0x200   : > { %p1005_p8 = pnand %p1004_p6, %p1000_p12 }
 0x202   : > { %1008 = shalt.err (!%p1005_p8)
}
 0x203   : > { %869 = dma.vmem_to_hbm [thread:$0]  (%p1442_p3), %s561_s29, 32, %s558_s8, %s547_s7  }
 0x204 PF: > { %s572_s22 = sand.u32 1, %s1039_s12   ;;  %p1443_p11 = scmp.ne.s32.totalorder %s1432_s19, 0 }
 0x205   : > { %p1444_p7 = scmp.ge.s32.totalorder %s1051_s15, 2  ;;  %s573_s23 = scalar_lea.sflag [#allocation4], %s572_s22 }
 0x207   : > { %p880_p10 = pnand %p1444_p7, %p1443_p11 }
 0x209   : > { %p881_p2 = pneg %p880_p10 }
 0x20b   : > { %1034 = dma.done.wait (%p881_p2), %s573_s23, 32  }
 0x20c   : > { %1036 = vsyncadd (%p881_p2), %s573_s23, 4294967264  ;;  %p17_p13 = scmp.ge.s32.totalorder %s1137_s24, 4   ;;  %s1445_s12 = smov %s1043_s13 }
 0x20d   : > { %s1446_s13 = smov %s1047_s14  ;;  %s1447_s14 = smov %s1154_s5 }
 0x20e   : > { %s1448_s15 = smov %s1137_s24  ;;  %19 = sbr.rel (!%p17_p13) target bundleno = 6 (0x6), region = 81 }
 0x213   :  { %578 = vsyncpa [#allocation3], 1 }
 0x214   :  { %580 = vsyncpa [#allocation3 + $0x1], 1 }
 0x215   :  { %581 = vsyncpa [#allocation6], 1 }
 0x216   :  { %582 = vsyncpa [#allocation4], 1 }
 0x217   :  { %584 = vsyncpa [#allocation4 + $0x1], 1 }

</bundles_post_ra>
